<compile_context>
chip_gen: v5e
topology: v5e:2x2
jax: 0.10.0
libtpu: 0.0.40
codegen_flags: <defaults>
</compile_context>

<pallas_src>
import jax
import jax.numpy as jnp
from jax.experimental import pallas as pl
from jax.experimental.pallas import tpu as pltpu

_LANE = 128  # TPU vreg lane width


def _round_up(v, m):
    return (v + m - 1) // m * m


def _edge_score_kernel(x_ref, w_ref, b_ref, o_ref):
    # x_ref: (K, TE)  edge features, edges on lanes (K = 2F = 10), bf16 or f32
    # w_ref: (C, K)   Linear weight (torch layout), f32
    # b_ref: (C, 1)   Linear bias, f32
    # o_ref: (C, TE)  lane-dense scores, f32
    x = x_ref[...].astype(jnp.float32)
    w = w_ref[...]
    k_dim = x.shape[0]
    # Hoist all K weight-column slices before the FMA loop (JAX does not CSE them).
    w_cols = [w[:, k:k + 1] for k in range(k_dim)]
    # VPU broadcast-FMA over the K=10 features. A (C x 10) contraction would use
    # <0.1% of the MXU; at these tile sizes the VALU work is ~at/under DMA time
    # on v5e/v6e.
    # TODO(synk): on v7x (3.2 TB/s HBM) consider jnp.dot(w, x) so the contraction
    # rides the otherwise-idle vector-extended (MXU) slot instead of the VALU.
    acc = w_cols[0] * x[0:1, :] + b_ref[...]
    for k in range(1, k_dim):
        acc = acc + w_cols[k] * x[k:k + 1, :]
    o_ref[...] = acc.astype(o_ref.dtype)


def mlp_predictor_forward(h, src, dst, weight, bias, *, edge_tile=32768,
                          feature_dtype=jnp.bfloat16, transpose_output=True):
    """h: [N, 1, F] node features (F=5), src/dst: [E] int32 edge endpoints,
    weight: [out_classes, 2F] (torch Linear layout), bias: [out_classes].
    Returns scores [E, out_classes] (or [out_classes, E] if transpose_output=False)."""
    h2 = jnp.squeeze(h, axis=1)  # [N, F] (matches torch.squeeze in apply_edges)
    E = int(src.shape[0])
    C, K = weight.shape
    F = h2.shape[1]
    assert K == 2 * F, "Linear in_features must equal 2 * node feature dim"

    # --- edge tiling along the lane axis (multiple of 128) --------------------
    edge_tile = max(_LANE, (min(int(edge_tile), 65536) // _LANE) * _LANE)
    n_blk = pl.cdiv(E, _LANE)  # number of 128-edge lane blocks
    # Keep >= 2 grid tiles whenever E spans >= 2 lane blocks (v7x megacore sharding).
    tile = min(edge_tile, _LANE * max(1, (n_blk + 1) // 2))
    E_pad = pl.cdiv(E, tile) * tile
    grid = (E_pad // tile,)

    # Pad only the cheap int32 index arrays (index 0 is a valid node).
    pad = E_pad - E
    src_p = jnp.pad(src, (0, pad)) if pad else src
    dst_p = jnp.pad(dst, (0, pad)) if pad else dst

    # Lane-dense edge-feature slab [2F, E_pad] (bf16): gathered from the tiny
    # transposed node table, so XLA never materializes / transposes an [E, 2F]
    # array, and the dominant per-edge traffic is halved vs. f32.
    # TODO(synk): a per-node partial-score restructure (s_src/s_dst = h2 @ W_half^T
    # gathered in-kernel from a resident VMEM table) would drop the slab entirely,
    # but needs a robust cross-lane gather; the gather stays in XLA for now.
    h2_t = h2.T.astype(feature_dtype)  # [F, N] (tiny)
    x_t = jnp.concatenate(
        [jnp.take(h2_t, src_p, axis=1), jnp.take(h2_t, dst_p, axis=1)], axis=0)

    w = weight.astype(jnp.float32)           # (C, K)
    b2 = bias.reshape(C, 1).astype(jnp.float32)

    # --- scoped-VMEM budget: double-buffered blocks + in-kernel f32 temporaries ---
    itemsize = jnp.dtype(feature_dtype).itemsize
    x_blk = _round_up(K, 8 * (4 // itemsize)) * tile * itemsize
    o_blk = _round_up(C, 8) * tile * 4
    x_f32 = _round_up(K, 8) * tile * 4
    vmem_need = 2 * (x_blk + o_blk) + x_f32 + 4 * o_blk + (4 << 20)
    vmem_limit = int(min(48 << 20, max(16 << 20, vmem_need)))

    out_t = pl.pallas_call(
        _edge_score_kernel,
        out_shape=jax.ShapeDtypeStruct((C, E_pad), jnp.float32),
        grid_spec=pltpu.PrefetchScalarGridSpec(
            num_scalar_prefetch=0,
            grid=grid,
            in_specs=[
                pl.BlockSpec((K, tile), lambda i: (0, i)),   # edge features (lane-dense)
                pl.BlockSpec((C, K), lambda i: (0, 0)),      # weight (resident, tiny)
                pl.BlockSpec((C, 1), lambda i: (0, 0)),      # bias   (resident, tiny)
            ],
            out_specs=pl.BlockSpec((C, tile), lambda i: (0, i)),
        ),
        compiler_params=pltpu.CompilerParams(
            dimension_semantics=("parallel",),
            vmem_limit_bytes=vmem_limit,
        ),
    )(x_t, w, b2)

    scores_ce = out_t[:, :E]  # [C, E] lane-dense
    if not transpose_output:
        return scores_ce
    # Module convention: [E, out_classes]. Consumers that can take [C, E] should
    # pass transpose_output=False and skip this lane-sparse extra pass.
    return scores_ce.T


def _reference_scores(h, src, dst, weight, bias, feat_dtype=None):
    """Plain-JAX reference (torch-equivalent). feat_dtype quantizes the gathered
    features the same way the kernel path does (for exact comparisons)."""
    h2 = jnp.squeeze(h, axis=1)
    x = jnp.concatenate([h2[src], h2[dst]], axis=1)
    if feat_dtype is not None:
        x = x.astype(feat_dtype).astype(jnp.float32)
    return x @ weight.T + bias


if __name__ == "__main__":
    key = jax.random.PRNGKey(0)
    k_h, k_w, k_b, k_h2, k_e1, k_e2 = jax.random.split(key, 6)

    F = 5              # per-node feature dim (concat -> 10 = Linear in_features)
    out_classes = 4

    # ---------- case 1: tiny graph (single tile, tail padding) ----------------
    N1, E1 = 16, 24
    h1 = jax.random.normal(k_h, (N1, 1, F), dtype=jnp.float32)
    src1 = jnp.concatenate([jnp.arange(N1), jnp.arange(N1 - 8)]).astype(jnp.int32)
    dst1 = jnp.concatenate([(jnp.arange(N1) + 1) % N1,
                            (jnp.arange(N1 - 8) + 2) % N1]).astype(jnp.int32)
    assert src1.shape[0] == E1 and dst1.shape[0] == E1
    weight = jax.random.normal(k_w, (out_classes, 2 * F), dtype=jnp.float32) * 0.1
    bias = jax.random.normal(k_b, (out_classes,), dtype=jnp.float32) * 0.1

    score1 = mlp_predictor_forward(h1, src1, dst1, weight, bias)
    jax.block_until_ready(score1)
    assert score1.shape == (E1, out_classes)
    ref1_q = _reference_scores(h1, src1, dst1, weight, bias, jnp.bfloat16)
    ref1_f = _reference_scores(h1, src1, dst1, weight, bias, None)
    assert jnp.allclose(score1, ref1_q, atol=1e-4), "case1: mismatch vs bf16-feature ref"
    assert jnp.allclose(score1, ref1_f, atol=5e-2), "case1: mismatch vs f32 ref"

    # ---------- case 2: multi-tile grid (E > edge_tile) + tail padding ---------
    N2, E2 = 64, 1000
    h2_in = jax.random.normal(k_h2, (N2, 1, F), dtype=jnp.float32)
    src2 = jax.random.randint(k_e1, (E2,), 0, N2, dtype=jnp.int32)
    dst2 = jax.random.randint(k_e2, (E2,), 0, N2, dtype=jnp.int32)

    score2 = mlp_predictor_forward(h2_in, src2, dst2, weight, bias, edge_tile=256)
    jax.block_until_ready(score2)
    assert score2.shape == (E2, out_classes)
    ref2_q = _reference_scores(h2_in, src2, dst2, weight, bias, jnp.bfloat16)
    ref2_f = _reference_scores(h2_in, src2, dst2, weight, bias, None)
    assert jnp.allclose(score2, ref2_q, atol=1e-4), "case2: mismatch vs bf16-feature ref"
    assert jnp.allclose(score2, ref2_f, atol=1e-1), "case2: mismatch vs f32 ref"

    # ---------- case 3: f32 feature path + lane-dense [C, E] output ------------
    score3 = mlp_predictor_forward(h1, src1, dst1, weight, bias,
                                   feature_dtype=jnp.float32,
                                   transpose_output=False)
    jax.block_until_ready(score3)
    assert score3.shape == (out_classes, E1)
    assert jnp.allclose(score3, ref1_f.T, atol=1e-5), "case3: mismatch vs f32 ref"

    print("KERNEL_OK")
</pallas_src>

<mosaic_0001>
module attributes {stable_mosaic.version = 11 : i64} {
  func.func @_edge_score_kernel(%arg0: i32, %arg1: memref<10x128xbf16, #tpu.memory_space<vmem>>, %arg2: memref<4x10xf32, #tpu.memory_space<vmem>>, %arg3: memref<4x1xf32, #tpu.memory_space<vmem>>, %arg4: memref<4x128xf32, #tpu.memory_space<vmem>>) attributes {dimension_semantics = [#tpu.dimension_semantics<parallel>], iteration_bounds = array<i64: 1>, scalar_prefetch = 0 : i64, scratch_operands = 0 : i64, tpu.core_type = #tpu.core_type<tc>, window_params = [{transform_indices = @transform_0, window_bounds = array<i64: 10, 128>}, {pipeline_mode = #tpu.pipeline_mode<synchronous>, transform_indices = @transform_1, window_bounds = array<i64: 4, 10>}, {pipeline_mode = #tpu.pipeline_mode<synchronous>, transform_indices = @transform_2, window_bounds = array<i64: 4, 1>}, {transform_indices = @transform_3, window_bounds = array<i64: 4, 128>}]} {
    %c0 = arith.constant 0 : index
    %c0_0 = arith.constant 0 : index
    %0 = vector.load %arg1[%c0, %c0_0] : memref<10x128xbf16, #tpu.memory_space<vmem>>, vector<10x128xbf16>
    %1 = arith.extf %0 : vector<10x128xbf16> to vector<10x128xf32>
    %c0_1 = arith.constant 0 : index
    %c0_2 = arith.constant 0 : index
    %2 = vector.load %arg2[%c0_1, %c0_2] : memref<4x10xf32, #tpu.memory_space<vmem>>, vector<4x10xf32>
    %3 = vector.extract_strided_slice %2 {offsets = [0, 0], sizes = [4, 1], strides = [1, 1]} : vector<4x10xf32> to vector<4x1xf32>
    %4 = vector.extract_strided_slice %2 {offsets = [0, 1], sizes = [4, 1], strides = [1, 1]} : vector<4x10xf32> to vector<4x1xf32>
    %5 = vector.extract_strided_slice %2 {offsets = [0, 2], sizes = [4, 1], strides = [1, 1]} : vector<4x10xf32> to vector<4x1xf32>
    %6 = vector.extract_strided_slice %2 {offsets = [0, 3], sizes = [4, 1], strides = [1, 1]} : vector<4x10xf32> to vector<4x1xf32>
    %7 = vector.extract_strided_slice %2 {offsets = [0, 4], sizes = [4, 1], strides = [1, 1]} : vector<4x10xf32> to vector<4x1xf32>
    %8 = vector.extract_strided_slice %2 {offsets = [0, 5], sizes = [4, 1], strides = [1, 1]} : vector<4x10xf32> to vector<4x1xf32>
    %9 = vector.extract_strided_slice %2 {offsets = [0, 6], sizes = [4, 1], strides = [1, 1]} : vector<4x10xf32> to vector<4x1xf32>
    %10 = vector.extract_strided_slice %2 {offsets = [0, 7], sizes = [4, 1], strides = [1, 1]} : vector<4x10xf32> to vector<4x1xf32>
    %11 = vector.extract_strided_slice %2 {offsets = [0, 8], sizes = [4, 1], strides = [1, 1]} : vector<4x10xf32> to vector<4x1xf32>
    %12 = vector.extract_strided_slice %2 {offsets = [0, 9], sizes = [4, 1], strides = [1, 1]} : vector<4x10xf32> to vector<4x1xf32>
    %13 = vector.extract_strided_slice %1 {offsets = [0, 0], sizes = [1, 128], strides = [1, 1]} : vector<10x128xf32> to vector<1x128xf32>
    %14 = vector.broadcast %3 : vector<4x1xf32> to vector<4x128xf32>
    %15 = vector.broadcast %13 : vector<1x128xf32> to vector<4x128xf32>
    %16 = arith.mulf %14, %15 : vector<4x128xf32>
    %c0_3 = arith.constant 0 : index
    %c0_4 = arith.constant 0 : index
    %17 = vector.load %arg3[%c0_3, %c0_4] : memref<4x1xf32, #tpu.memory_space<vmem>>, vector<4x1xf32>
    %18 = vector.broadcast %17 : vector<4x1xf32> to vector<4x128xf32>
    %19 = arith.addf %16, %18 : vector<4x128xf32>
    %20 = vector.extract_strided_slice %1 {offsets = [1, 0], sizes = [1, 128], strides = [1, 1]} : vector<10x128xf32> to vector<1x128xf32>
    %21 = vector.broadcast %4 : vector<4x1xf32> to vector<4x128xf32>
    %22 = vector.broadcast %20 : vector<1x128xf32> to vector<4x128xf32>
    %23 = arith.mulf %21, %22 : vector<4x128xf32>
    %24 = arith.addf %19, %23 : vector<4x128xf32>
    %25 = vector.extract_strided_slice %1 {offsets = [2, 0], sizes = [1, 128], strides = [1, 1]} : vector<10x128xf32> to vector<1x128xf32>
    %26 = vector.broadcast %5 : vector<4x1xf32> to vector<4x128xf32>
    %27 = vector.broadcast %25 : vector<1x128xf32> to vector<4x128xf32>
    %28 = arith.mulf %26, %27 : vector<4x128xf32>
    %29 = arith.addf %24, %28 : vector<4x128xf32>
    %30 = vector.extract_strided_slice %1 {offsets = [3, 0], sizes = [1, 128], strides = [1, 1]} : vector<10x128xf32> to vector<1x128xf32>
    %31 = vector.broadcast %6 : vector<4x1xf32> to vector<4x128xf32>
    %32 = vector.broadcast %30 : vector<1x128xf32> to vector<4x128xf32>
    %33 = arith.mulf %31, %32 : vector<4x128xf32>
    %34 = arith.addf %29, %33 : vector<4x128xf32>
    %35 = vector.extract_strided_slice %1 {offsets = [4, 0], sizes = [1, 128], strides = [1, 1]} : vector<10x128xf32> to vector<1x128xf32>
    %36 = vector.broadcast %7 : vector<4x1xf32> to vector<4x128xf32>
    %37 = vector.broadcast %35 : vector<1x128xf32> to vector<4x128xf32>
    %38 = arith.mulf %36, %37 : vector<4x128xf32>
    %39 = arith.addf %34, %38 : vector<4x128xf32>
    %40 = vector.extract_strided_slice %1 {offsets = [5, 0], sizes = [1, 128], strides = [1, 1]} : vector<10x128xf32> to vector<1x128xf32>
    %41 = vector.broadcast %8 : vector<4x1xf32> to vector<4x128xf32>
    %42 = vector.broadcast %40 : vector<1x128xf32> to vector<4x128xf32>
    %43 = arith.mulf %41, %42 : vector<4x128xf32>
    %44 = arith.addf %39, %43 : vector<4x128xf32>
    %45 = vector.extract_strided_slice %1 {offsets = [6, 0], sizes = [1, 128], strides = [1, 1]} : vector<10x128xf32> to vector<1x128xf32>
    %46 = vector.broadcast %9 : vector<4x1xf32> to vector<4x128xf32>
    %47 = vector.broadcast %45 : vector<1x128xf32> to vector<4x128xf32>
    %48 = arith.mulf %46, %47 : vector<4x128xf32>
    %49 = arith.addf %44, %48 : vector<4x128xf32>
    %50 = vector.extract_strided_slice %1 {offsets = [7, 0], sizes = [1, 128], strides = [1, 1]} : vector<10x128xf32> to vector<1x128xf32>
    %51 = vector.broadcast %10 : vector<4x1xf32> to vector<4x128xf32>
    %52 = vector.broadcast %50 : vector<1x128xf32> to vector<4x128xf32>
    %53 = arith.mulf %51, %52 : vector<4x128xf32>
    %54 = arith.addf %49, %53 : vector<4x128xf32>
    %55 = vector.extract_strided_slice %1 {offsets = [8, 0], sizes = [1, 128], strides = [1, 1]} : vector<10x128xf32> to vector<1x128xf32>
    %56 = vector.broadcast %11 : vector<4x1xf32> to vector<4x128xf32>
    %57 = vector.broadcast %55 : vector<1x128xf32> to vector<4x128xf32>
    %58 = arith.mulf %56, %57 : vector<4x128xf32>
    %59 = arith.addf %54, %58 : vector<4x128xf32>
    %60 = vector.extract_strided_slice %1 {offsets = [9, 0], sizes = [1, 128], strides = [1, 1]} : vector<10x128xf32> to vector<1x128xf32>
    %61 = vector.broadcast %12 : vector<4x1xf32> to vector<4x128xf32>
    %62 = vector.broadcast %60 : vector<1x128xf32> to vector<4x128xf32>
    %63 = arith.mulf %61, %62 : vector<4x128xf32>
    %64 = arith.addf %59, %63 : vector<4x128xf32>
    %c0_5 = arith.constant 0 : index
    %c0_6 = arith.constant 0 : index
    %65 = vector.load %arg4[%c0_5, %c0_6] : memref<4x128xf32, #tpu.memory_space<vmem>>, vector<4x128xf32>
    tpu.vector_store %arg4[%c0_5, %c0_6], %64 {strides = array<i32>} : memref<4x128xf32, #tpu.memory_space<vmem>>, vector<4x128xf32>,
    return
  }
  func.func @transform_0(%arg0: i32) -> (i32, i32) {
    %c0_i32 = arith.constant 0 : i32
    %c0_i32_0 = arith.constant 0 : i32
    return %c0_i32, %arg0 : i32, i32
  }
  func.func @transform_1(%arg0: i32) -> (i32, i32) {
    %c0_i32 = arith.constant 0 : i32
    %c0_i32_0 = arith.constant 0 : i32
    %c0_i32_1 = arith.constant 0 : i32
    return %c0_i32, %c0_i32_0 : i32, i32
  }
  func.func @transform_2(%arg0: i32) -> (i32, i32) {
    %c0_i32 = arith.constant 0 : i32
    %c0_i32_0 = arith.constant 0 : i32
    %c0_i32_1 = arith.constant 0 : i32
    return %c0_i32, %c0_i32_0 : i32, i32
  }
  func.func @transform_3(%arg0: i32) -> (i32, i32) {
    %c0_i32 = arith.constant 0 : i32
    %c0_i32_0 = arith.constant 0 : i32
    return %c0_i32, %arg0 : i32, i32
  }
}

</mosaic_0001>

<bundles_post_ra>
// kernel: tpu_custom_call.1
= control target key start
LH: loop header
LB: loop body
LE: loop exit
PB: predicated region body
PF: predicated region fallthrough
CT: control target
= control target key end

     0   :  { %8 = vsyncpa [#allocation3], 0  ;;  %s254_s0 = inlined_call_operand.hbm [shape: bf16[10,128], index: 0, kind: input, shape index: {}]   ;;  %s255_s1 = inlined_call_operand.vmem [shape: f32[4,10], index: 1, kind: input, shape index: {}]   ;;  %s256_s2 = inlined_call_operand.vmem [shape: f32[4,1], index: 2, kind: input, shape index: {}]   ;;  %s257_s3 = inlined_call_operand.hbm [shape: f32[4,128], index: 3, kind: output, shape index: {}]  }
   0x1   :  { %9 = vsyncpa [#allocation4], 0  ;;  %s14_s14 = sshll.u32 %s254_s0, 4  ;;  %s208_s15 = smov [#allocation2]   ;;  %s15_s14 = int_to_ptr.hbm [resolvable:$true] %s14_s14 }
   0x2   :  { %s16_s16 = sshll.u32 %s208_s15, 4  ;;  %s209_s17 = smov 64   ;;  %s17_s16 = int_to_ptr.vmem [resolvable:$true] %s16_s16 }
   0x3   :  { %s210_s18 = smov 4  }
   0x4   :  { %22 = dma.hbm_to_vmem [thread:$0]  %s15_s14, 128, %s17_s16, [#allocation3], %s209_s17, %s209_s17, %s210_s18  }
   0x5   :  { %204 = dma.done.wait [#allocation3], 128  }
   0x6   :  { %205 = vsyncadd [#allocation3], 4294967168  ;;  %v211_v0 = vmov 1   ;;  %v212_v1 = vmov 0   ;;  %v213_v2 = vmov 3   ;;  %v214_v5 = vmov 2  }
   0x7   :  { %146 = vset.pattern.permute.xlu1 %v211_v0  ;;  %145 = vset.pattern.permute.xlu0 %v212_v1  ;;  %v35_v3 = vld [vmem:[%s255_s1] sm:$0xf]  ;;  %v215_v6 = vmov 4   ;;  %v216_v7 = vmov 5   ;;  %v217_v8 = vmov 6   ;;  %v218_v9 = vmov 7  }
   0x8   :  { %148 = vset.pattern.permute.xlu2 %v213_v2  ;;  %51 = vperm.xlu1 %146, %v35_v3   ;;  %v43_v4 = vld [vmem:[%s256_s2] sm:$0xf]  ;;  %v219_v10 = vmov 9   ;;  %v220_v11 = vmov 8   ;;  %v32_v39 = vld [vmem:[#allocation2 + $0x4] sm:$0x1] }
   0x9   :  { %38 = vperm.xlu0 %145, %v35_v3   ;;  %65 = vperm.xlu2 %148, %v35_v3   ;;  %v31_v13 = vld [vmem:[#allocation2] sm:$0xf]  ;;  %v34_v45 = vunpack.c.l.bf16 %v32_v39  ;;  %s221_s1 = smov [#allocation5]   ;;  %s121_s24 = sshll.u32 %s257_s3, 4  ;;  %s122_s24 = int_to_ptr.hbm [resolvable:$true] %s121_s24 }
   0xa   :  { %v33_v16 = vunpack.c.l.bf16 %v31_v13  ;;  %s119_s2 = sshll.u32 %s221_s1, 4  ;;  %s120_s2 = int_to_ptr.vmem [resolvable:$true] %s119_s2 }
   0xb   :  { %v103_v48 = vperm.slane %v34_v45, 0  ;;  %v110_v49 = vperm.slane %v34_v45, 1 }
   0xc   :  { %v41_v17 = vperm.slane %v33_v16, 0  ;;  %v54_v18 = vperm.slane %v33_v16, 1  ;;  %v61_v20 = vperm.slane %v33_v16, 2  ;;  %v68_v24 = vperm.slane %v33_v16, 3 }
   0xd   :  { %v75_v29 = vperm.slane %v33_v16, 4  ;;  %v82_v32 = vperm.slane %v33_v16, 5  ;;  %v89_v36 = vperm.slane %v33_v16, 6  ;;  %v96_v44 = vperm.slane %v33_v16, 7 }
  0x10   :  { %147 = vset.pattern.permute.xlu1 %v214_v5 }
  0x11   :  { %46 = vperm.xlu0 %145, %v43_v4   ;;  %58 = vperm.xlu1 %147, %v35_v3  }
  0x12   :  { %149 = vset.pattern.permute.xlu2 %v215_v6 }
  0x13   :  { %72 = vperm.xlu2 %149, %v35_v3  }
  0x19   :  { %150 = vset.pattern.permute.xlu0 %v216_v7  ;;  %151 = vset.pattern.permute.xlu1 %v217_v8 }
  0x1a   :  { %79 = vperm.xlu0 %150, %v35_v3   ;;  %86 = vperm.xlu1 %151, %v35_v3  }
  0x1b   :  { %152 = vset.pattern.permute.xlu2 %v218_v9 }
  0x1c   :  { %93 = vperm.xlu2 %152, %v35_v3  }
  0x22   :  { %155 = vset.pattern.permute.xlu0 %v219_v10  ;;  %153 = vset.pattern.permute.xlu1 %v220_v11 }
  0x23   :  { %100 = vperm.xlu1 %153, %v35_v3  }
  0x24   :  { %154 = vset.pattern.permute.xlu2 %v219_v10 }
  0x25   :  { %107 = vperm.xlu2 %154, %v35_v3  }
  0x63   :  { %v66_v12 = vpop.permute.xlu2 %65 }
  0x64   :  { %v69_v30 = vmul.f32 %v68_v24, %v66_v12 }
  0x6d   :  { %v73_v19 = vpop.permute.xlu2 %72 }
  0x6e   :  { %v76_v34 = vmul.f32 %v75_v29, %v73_v19 }
  0x76   :  { %v94_v35 = vpop.permute.xlu2 %93 }
  0x77   :  { %v97_v47 = vmul.f32 %v96_v44, %v94_v35 }
  0x7a   :  { %v52_v14 = vpop.permute.xlu1 %51 }
  0x7b   :  { %v39_v15 = vpop.permute.xlu0 %38  ;;  %v55_v23 = vmul.f32 %v54_v18, %v52_v14 }
  0x7c   :  { %v42_v21 = vmul.f32 %v41_v17, %v39_v15 }
  0x7f   :  { %v108_v50 = vpop.permute.xlu2 %107 }
  0x80   :  { %v111_v54 = vmul.f32 %v110_v49, %v108_v50 }
  0x83   :  { %v47_v22 = vpop.permute.xlu0 %46  ;;  %v59_v26 = vpop.permute.xlu1 %58 }
  0x84   :  { %v49_v25 = vadd.f32 %v47_v22, %v42_v21  ;;  %v62_v27 = vmul.f32 %v61_v20, %v59_v26 }
  0x86   :  { %v56_v28 = vadd.f32 %v55_v23, %v49_v25 }
  0x88   :  { %v63_v31 = vadd.f32 %v62_v27, %v56_v28 }
  0x8a   :  { %v70_v33 = vadd.f32 %v69_v30, %v63_v31 }
  0x8c   :  { %v77_v37 = vadd.f32 %v76_v34, %v70_v33  ;;  %v80_v38 = vpop.permute.xlu0 %79  ;;  %v87_v41 = vpop.permute.xlu1 %86 }
  0x8d   :  { %v83_v40 = vmul.f32 %v82_v32, %v80_v38  ;;  %v90_v43 = vmul.f32 %v89_v36, %v87_v41 }
  0x8f   :  { %v84_v42 = vadd.f32 %v83_v40, %v77_v37 }
  0x91   :  { %v91_v46 = vadd.f32 %v90_v43, %v84_v42 }
  0x93   :  { %v98_v52 = vadd.f32 %v97_v47, %v91_v46 }
  0x95   :  { %v101_v51 = vpop.permute.xlu1 %100 }
  0x96   :  { %v104_v53 = vmul.f32 %v103_v48, %v101_v51 }
  0x98   :  { %v105_v55 = vadd.f32 %v104_v53, %v98_v52 }
  0x9a   :  { %v112_v56 = vadd.f32 %v111_v54, %v105_v55 }
  0x9c   :  { %113 = vst [vmem:[#allocation5] sm:$0xf] %v112_v56 }
  0x9d   :  { %124 = dma.vmem_to_hbm [thread:$0]  %s120_s2, 64, %s122_s24, [#allocation4]  }
  0x9e   :  { %206 = dma.done.wait [#allocation4], 64  }
  0x9f   :  { %207 = vsyncadd [#allocation4], 4294967232 }
  0xa0   :  { %129 = vsyncpa [#allocation3], 1 }
  0xa1   :  { %130 = vsyncpa [#allocation4], 1 }

</bundles_post_ra>
